<compile_context>
chip_gen: v5e
topology: v5e:2x2
jax: 0.10.0
libtpu: 0.0.40
codegen_flags: <defaults>
</compile_context>

<pallas_src>
import jax
import jax.numpy as jnp
from jax.experimental import pallas as pl
from jax.experimental.pallas import tpu as pltpu

NEG_BIG = -1e30  # padded-vocab logit bias; exp(NEG_BIG - m) underflows to 0


def decoder_decode_kernel(tok_ref, h0_ref, emb_ref, w_ih_ref, w_hh_ref,
                          b_ih_ref, b_hh_ref, w_out_ref, b_out_ref,
                          logp_ref, h_final_ref, h_carry):
    """One grid step == one DecoderRNN.forward step.

    tok_ref:    (T,)       int32 token ids (SMEM, scalar prefetch)
    h0_ref:     (1, H)     initial hidden state (f32, resident)
    emb_ref:    (V, H)     embedding table (bf16, resident)
    w_ih_ref:   (3, H, H)  GRU input weights per gate (r, z, n), bf16
    w_hh_ref:   (3, H, H)  GRU hidden weights per gate, bf16
    b_ih_ref:   (3, 1, H)  GRU input biases, f32
    b_hh_ref:   (3, 1, H)  GRU hidden biases, f32
    w_out_ref:  (H, Vp)    output projection, vocab padded to 128 lanes, bf16
    b_out_ref:  (1, Vp)    output bias, padded lanes = NEG_BIG, f32
    logp_ref:   (1, 1, Vp) log_softmax output block for this step      [out]
    h_final_ref:(1, H)     final hidden state (written at last step)   [out]
    h_carry:    (1, H)     VMEM scratch carrying the recurrence
    """
    t = pl.program_id(0)
    V, H = emb_ref.shape

    @pl.when(t == 0)
    def _init():
        h_carry[...] = h0_ref[...]

    tok = tok_ref[t]

    # embedding(input): one-hot @ table keeps the gather on-chip (table resident).
    vocab_ids = jax.lax.broadcasted_iota(jnp.int32, (1, V), 1)
    onehot = (vocab_ids == tok).astype(emb_ref.dtype)
    x = jnp.dot(onehot, emb_ref[...], preferred_element_type=jnp.float32)  # (1, H)

    # F.relu(embedded)
    x = jnp.maximum(x, 0.0).astype(jnp.bfloat16)

    h = h_carry[...]                       # f32 recurrence
    h_b = h.astype(jnp.bfloat16)

    def gates(g):
        gi = jnp.dot(x, w_ih_ref[g], preferred_element_type=jnp.float32) + b_ih_ref[g]
        gh = jnp.dot(h_b, w_hh_ref[g], preferred_element_type=jnp.float32) + b_hh_ref[g]
        return gi, gh

    gi_r, gh_r = gates(0)
    gi_z, gh_z = gates(1)
    gi_n, gh_n = gates(2)

    # PyTorch GRU cell semantics.
    r = jax.nn.sigmoid(gi_r + gh_r)
    z = jax.nn.sigmoid(gi_z + gh_z)
    n = jnp.tanh(gi_n + r * gh_n)
    h_new = (1.0 - z) * n + z * h
    h_carry[...] = h_new

    # Linear + LogSoftmax(dim=1). Padded vocab lanes hold NEG_BIG bias so they
    # contribute exp(.) == 0; the (1, Vp=128k) store is lane-dense.
    logits = jnp.dot(h_new.astype(jnp.bfloat16), w_out_ref[...],
                     preferred_element_type=jnp.float32) + b_out_ref[...]
    m = jnp.max(logits, axis=-1, keepdims=True)
    lse = jnp.log(jnp.sum(jnp.exp(logits - m), axis=-1, keepdims=True)) + m
    logp_ref[...] = (logits - lse).reshape(logp_ref.shape)

    @pl.when(t == pl.num_programs(0) - 1)
    def _finish():
        h_final_ref[...] = h_new


def decoder_rnn_decode(tokens, hidden, kp):
    """Run T chained DecoderRNN.forward steps in one fused kernel.

    tokens: (T,) int32, hidden: (1, 1, H) f32.
    Returns (log_probs (T, V), final hidden (1, 1, H)).
    """
    T = tokens.shape[0]
    emb = kp["embedding"]
    V, H = emb.shape
    Vp = kp["w_out"].shape[1]

    h0 = hidden.reshape(1, H).astype(jnp.float32)
    const2 = lambda t, toks: (0, 0)
    const3 = lambda t, toks: (0, 0, 0)

    grid_spec = pltpu.PrefetchScalarGridSpec(
        num_scalar_prefetch=1,                # tokens -> SMEM
        grid=(T,),
        in_specs=[
            pl.BlockSpec((1, H), const2),     # h0          (resident)
            pl.BlockSpec((V, H), const2),     # embedding   (DMA'd once)
            pl.BlockSpec((3, H, H), const3),  # w_ih per gate
            pl.BlockSpec((3, H, H), const3),  # w_hh per gate
            pl.BlockSpec((3, 1, H), const3),  # b_ih
            pl.BlockSpec((3, 1, H), const3),  # b_hh
            pl.BlockSpec((H, Vp), const2),    # w_out (vocab padded to 128)
            pl.BlockSpec((1, Vp), const2),    # b_out (padded lanes = NEG_BIG)
        ],
        out_specs=(
            pl.BlockSpec((1, 1, Vp), lambda t, toks: (t, 0, 0)),  # per-step logp
            pl.BlockSpec((1, H), const2),                         # final hidden
        ),
        scratch_shapes=[pltpu.VMEM((1, H), jnp.float32)],         # hidden carry
    )

    logp_pad, h_fin = pl.pallas_call(
        decoder_decode_kernel,
        out_shape=(
            jax.ShapeDtypeStruct((T, 1, Vp), jnp.float32),
            jax.ShapeDtypeStruct((1, H), jnp.float32),
        ),
        grid_spec=grid_spec,
        compiler_params=pltpu.CompilerParams(
            dimension_semantics=("arbitrary",)),  # time axis is a recurrence
    )(tokens.astype(jnp.int32), h0, emb,
      kp["w_ih"], kp["w_hh"], kp["b_ih"], kp["b_hh"], kp["w_out"], kp["b_out"])

    logp = logp_pad.reshape(T, Vp)[:, :V]
    return logp, h_fin.reshape(1, 1, H)


def init_params(key, hidden_size, output_size):
    """Parameter init matching the PyTorch module's shapes/distributions.

    nn.Embedding(V, H): N(0, 1); GRU / Linear: U(-1/sqrt(H), 1/sqrt(H)).
    GRU weights are stored per gate (r, z, n), transposed to (in, out).
    """
    H, V = hidden_size, output_size
    ks = jax.random.split(key, 7)
    bound = 1.0 / jnp.sqrt(jnp.float32(H))
    u = lambda k, shape: jax.random.uniform(
        k, shape, jnp.float32, minval=-bound, maxval=bound)
    return {
        "embedding": jax.random.normal(ks[0], (V, H), jnp.float32),
        "w_ih": u(ks[1], (3, H, H)),
        "w_hh": u(ks[2], (3, H, H)),
        "b_ih": u(ks[3], (3, H)),
        "b_hh": u(ks[4], (3, H)),
        "w_out": u(ks[5], (H, V)),
        "b_out": u(ks[6], (V,)),
    }


def pack_params(params):
    """Kernel layout: bf16 weights, f32 biases, vocab padded to 128 lanes."""
    H = params["embedding"].shape[1]
    V = params["w_out"].shape[1]
    Vp = 128 * pl.cdiv(V, 128)
    w_out = jnp.zeros((H, Vp), jnp.bfloat16).at[:, :V].set(
        params["w_out"].astype(jnp.bfloat16))
    b_out = jnp.full((1, Vp), NEG_BIG, jnp.float32).at[0, :V].set(
        params["b_out"].astype(jnp.float32))
    return {
        "embedding": params["embedding"].astype(jnp.bfloat16),
        "w_ih": params["w_ih"].astype(jnp.bfloat16),
        "w_hh": params["w_hh"].astype(jnp.bfloat16),
        "b_ih": params["b_ih"].reshape(3, 1, H).astype(jnp.float32),
        "b_hh": params["b_hh"].reshape(3, 1, H).astype(jnp.float32),
        "w_out": w_out,
        "b_out": b_out,
    }


def reference_decode(tokens, hidden, kp):
    """Pure-JAX reference mirroring the kernel's dtype behaviour step by step."""
    emb = kp["embedding"].astype(jnp.float32)
    V_total = emb.shape[0]
    H = emb.shape[1]
    w_ih, w_hh = kp["w_ih"], kp["w_hh"]
    b_ih, b_hh = kp["b_ih"], kp["b_hh"]
    w_out = kp["w_out"][:, :V_total]
    b_out = kp["b_out"][0, :V_total]

    h = hidden.reshape(1, H).astype(jnp.float32)
    outs = []
    for i in range(tokens.shape[0]):
        x = jnp.maximum(emb[tokens[i]].reshape(1, H), 0.0).astype(jnp.bfloat16)
        h_b = h.astype(jnp.bfloat16)
        gi = [jnp.dot(x, w_ih[g], preferred_element_type=jnp.float32) + b_ih[g]
              for g in range(3)]
        gh = [jnp.dot(h_b, w_hh[g], preferred_element_type=jnp.float32) + b_hh[g]
              for g in range(3)]
        r = jax.nn.sigmoid(gi[0] + gh[0])
        z = jax.nn.sigmoid(gi[1] + gh[1])
        n = jnp.tanh(gi[2] + r * gh[2])
        h = (1.0 - z) * n + z * h
        logits = jnp.dot(h.astype(jnp.bfloat16), w_out,
                         preferred_element_type=jnp.float32) + b_out
        outs.append(jax.nn.log_softmax(logits, axis=-1))
    return jnp.concatenate(outs, axis=0), h.reshape(1, 1, H)


if __name__ == "__main__":
    hidden_size = 32
    output_size = 40   # decoder vocabulary size
    T = 8              # number of chained forward() steps

    key = jax.random.PRNGKey(0)
    pkey, tkey = jax.random.split(key)
    params = init_params(pkey, hidden_size, output_size)
    kparams = pack_params(params)

    tokens = jax.random.randint(tkey, (T,), 0, output_size, dtype=jnp.int32)
    hidden = jnp.zeros((1, 1, hidden_size), jnp.float32)   # initHidden()

    logp, h_fin = decoder_rnn_decode(tokens, hidden, kparams)
    logp = jax.block_until_ready(logp)
    h_fin = jax.block_until_ready(h_fin)

    ref_logp, ref_h = reference_decode(tokens, hidden, kparams)

    assert logp.shape == (T, output_size)
    assert h_fin.shape == (1, 1, hidden_size)
    assert jnp.allclose(logp, ref_logp, atol=5e-3, rtol=5e-3), \
        float(jnp.max(jnp.abs(logp - ref_logp)))
    assert jnp.allclose(h_fin, ref_h, atol=5e-3, rtol=5e-3), \
        float(jnp.max(jnp.abs(h_fin - ref_h)))

    print("KERNEL_OK")
</pallas_src>

<mosaic_0001>
module attributes {stable_mosaic.version = 11 : i64} {
  func.func @decoder_decode_kernel(%arg0: i32, %arg1: memref<8xi32, #tpu.memory_space<smem>>, %arg2: memref<1x32xf32, #tpu.memory_space<vmem>>, %arg3: memref<40x32xbf16, #tpu.memory_space<vmem>>, %arg4: memref<3x32x32xbf16, #tpu.memory_space<vmem>>, %arg5: memref<3x32x32xbf16, #tpu.memory_space<vmem>>, %arg6: memref<3x1x32xf32, #tpu.memory_space<vmem>>, %arg7: memref<3x1x32xf32, #tpu.memory_space<vmem>>, %arg8: memref<32x128xbf16, #tpu.memory_space<vmem>>, %arg9: memref<1x128xf32, #tpu.memory_space<vmem>>, %arg10: memref<1x1x128xf32, #tpu.memory_space<vmem>>, %arg11: memref<1x32xf32, #tpu.memory_space<vmem>>, %arg12: memref<1x32xf32, #tpu.memory_space<vmem>>) attributes {dimension_semantics = [#tpu.dimension_semantics<arbitrary>], iteration_bounds = array<i64: 8>, scalar_prefetch = 1 : i64, scratch_operands = 1 : i64, tpu.core_type = #tpu.core_type<tc>, window_params = [{pipeline_mode = #tpu.pipeline_mode<synchronous>, transform_indices = @transform_0, window_bounds = array<i64: 1, 32>}, {pipeline_mode = #tpu.pipeline_mode<synchronous>, transform_indices = @transform_1, window_bounds = array<i64: 40, 32>}, {pipeline_mode = #tpu.pipeline_mode<synchronous>, transform_indices = @transform_2, window_bounds = array<i64: 3, 32, 32>}, {pipeline_mode = #tpu.pipeline_mode<synchronous>, transform_indices = @transform_3, window_bounds = array<i64: 3, 32, 32>}, {pipeline_mode = #tpu.pipeline_mode<synchronous>, transform_indices = @transform_4, window_bounds = array<i64: 3, 1, 32>}, {pipeline_mode = #tpu.pipeline_mode<synchronous>, transform_indices = @transform_5, window_bounds = array<i64: 3, 1, 32>}, {pipeline_mode = #tpu.pipeline_mode<synchronous>, transform_indices = @transform_6, window_bounds = array<i64: 32, 128>}, {pipeline_mode = #tpu.pipeline_mode<synchronous>, transform_indices = @transform_7, window_bounds = array<i64: 1, 128>}, {transform_indices = @transform_8, window_bounds = array<i64: 1, 1, 128>}, {pipeline_mode = #tpu.pipeline_mode<synchronous>, transform_indices = @transform_9, window_bounds = array<i64: 1, 32>}]} {
    %c0_i32 = arith.constant 0 : i32
    %0 = arith.cmpi eq, %arg0, %c0_i32 : i32
    %1 = arith.extui %0 : i1 to i32
    %c0_i32_0 = arith.constant 0 : i32
    %2 = arith.cmpi ne, %1, %c0_i32_0 : i32
    scf.if %2 {
      %c0_61 = arith.constant 0 : index
      %c0_62 = arith.constant 0 : index
      %96 = vector.load %arg2[%c0_61, %c0_62] : memref<1x32xf32, #tpu.memory_space<vmem>>, vector<1x32xf32>
      %c0_63 = arith.constant 0 : index
      %c0_64 = arith.constant 0 : index
      %97 = vector.load %arg12[%c0_63, %c0_64] : memref<1x32xf32, #tpu.memory_space<vmem>>, vector<1x32xf32>
      tpu.vector_store %arg12[%c0_63, %c0_64], %96 {strides = array<i32>} : memref<1x32xf32, #tpu.memory_space<vmem>>, vector<1x32xf32>,
    } else {
    }
    %3 = arith.index_cast %arg0 : i32 to index
    %4 = memref.load %arg1[%3] : memref<8xi32, #tpu.memory_space<smem>>
    %5 = tpu.iota {dimensions = array<i32: 1>} : vector<1x40xi32>
    %6 = vector.broadcast %4 : i32 to vector<1x40xi32>
    %7 = arith.cmpi eq, %5, %6 : vector<1x40xi32>
    %8 = arith.extui %7 : vector<1x40xi1> to vector<1x40xi32>
    %9 = arith.sitofp %8 : vector<1x40xi32> to vector<1x40xf32>
    %10 = arith.truncf %9 : vector<1x40xf32> to vector<1x40xbf16>
    %c0 = arith.constant 0 : index
    %c0_1 = arith.constant 0 : index
    %11 = vector.load %arg3[%c0, %c0_1] : memref<40x32xbf16, #tpu.memory_space<vmem>>, vector<40x32xbf16>
    %cst = arith.constant dense<0.000000e+00> : vector<1x32xf32>
    %12 = tpu.matmul %10, %11, %cst {dimension_numbers = #tpu.dot_dimension_numbers<[1], [0], [0], [1], [0, 0, 1, 1], [], []>} : vector<1x40xbf16>, vector<40x32xbf16>, vector<1x32xf32> -> vector<1x32xf32>
    %cst_2 = arith.constant 0.000000e+00 : f32
    %13 = vector.broadcast %cst_2 : f32 to vector<1x32xf32>
    %14 = arith.maximumf %12, %13 : vector<1x32xf32>
    %15 = arith.truncf %14 : vector<1x32xf32> to vector<1x32xbf16>
    %c0_3 = arith.constant 0 : index
    %c0_4 = arith.constant 0 : index
    %16 = vector.load %arg12[%c0_3, %c0_4] : memref<1x32xf32, #tpu.memory_space<vmem>>, vector<1x32xf32>
    %17 = arith.truncf %16 : vector<1x32xf32> to vector<1x32xbf16>
    %c0_5 = arith.constant 0 : index
    %c0_6 = arith.constant 0 : index
    %c0_7 = arith.constant 0 : index
    %18 = vector.load %arg4[%c0_5, %c0_6, %c0_7] : memref<3x32x32xbf16, #tpu.memory_space<vmem>>, vector<1x32x32xbf16>
    %19 = vector.shape_cast %18 : vector<1x32x32xbf16> to vector<32x32xbf16>
    %cst_8 = arith.constant dense<0.000000e+00> : vector<1x32xf32>
    %20 = tpu.matmul %15, %19, %cst_8 {dimension_numbers = #tpu.dot_dimension_numbers<[1], [0], [0], [1], [0, 0, 1, 1], [], []>} : vector<1x32xbf16>, vector<32x32xbf16>, vector<1x32xf32> -> vector<1x32xf32>
    %c0_9 = arith.constant 0 : index
    %c0_10 = arith.constant 0 : index
    %c0_11 = arith.constant 0 : index
    %21 = vector.load %arg6[%c0_9, %c0_10, %c0_11] : memref<3x1x32xf32, #tpu.memory_space<vmem>>, vector<1x1x32xf32>
    %22 = vector.shape_cast %21 : vector<1x1x32xf32> to vector<1x32xf32>
    %23 = arith.addf %20, %22 : vector<1x32xf32>
    %c0_12 = arith.constant 0 : index
    %c0_13 = arith.constant 0 : index
    %c0_14 = arith.constant 0 : index
    %24 = vector.load %arg5[%c0_12, %c0_13, %c0_14] : memref<3x32x32xbf16, #tpu.memory_space<vmem>>, vector<1x32x32xbf16>
    %25 = vector.shape_cast %24 : vector<1x32x32xbf16> to vector<32x32xbf16>
    %cst_15 = arith.constant dense<0.000000e+00> : vector<1x32xf32>
    %26 = tpu.matmul %17, %25, %cst_15 {dimension_numbers = #tpu.dot_dimension_numbers<[1], [0], [0], [1], [0, 0, 1, 1], [], []>} : vector<1x32xbf16>, vector<32x32xbf16>, vector<1x32xf32> -> vector<1x32xf32>
    %c0_16 = arith.constant 0 : index
    %c0_17 = arith.constant 0 : index
    %c0_18 = arith.constant 0 : index
    %27 = vector.load %arg7[%c0_16, %c0_17, %c0_18] : memref<3x1x32xf32, #tpu.memory_space<vmem>>, vector<1x1x32xf32>
    %28 = vector.shape_cast %27 : vector<1x1x32xf32> to vector<1x32xf32>
    %29 = arith.addf %26, %28 : vector<1x32xf32>
    %c1 = arith.constant 1 : index
    %c0_19 = arith.constant 0 : index
    %c0_20 = arith.constant 0 : index
    %30 = vector.load %arg4[%c1, %c0_19, %c0_20] : memref<3x32x32xbf16, #tpu.memory_space<vmem>>, vector<1x32x32xbf16>
    %31 = vector.shape_cast %30 : vector<1x32x32xbf16> to vector<32x32xbf16>
    %cst_21 = arith.constant dense<0.000000e+00> : vector<1x32xf32>
    %32 = tpu.matmul %15, %31, %cst_21 {dimension_numbers = #tpu.dot_dimension_numbers<[1], [0], [0], [1], [0, 0, 1, 1], [], []>} : vector<1x32xbf16>, vector<32x32xbf16>, vector<1x32xf32> -> vector<1x32xf32>
    %c1_22 = arith.constant 1 : index
    %c0_23 = arith.constant 0 : index
    %c0_24 = arith.constant 0 : index
    %33 = vector.load %arg6[%c1_22, %c0_23, %c0_24] : memref<3x1x32xf32, #tpu.memory_space<vmem>>, vector<1x1x32xf32>
    %34 = vector.shape_cast %33 : vector<1x1x32xf32> to vector<1x32xf32>
    %35 = arith.addf %32, %34 : vector<1x32xf32>
    %c1_25 = arith.constant 1 : index
    %c0_26 = arith.constant 0 : index
    %c0_27 = arith.constant 0 : index
    %36 = vector.load %arg5[%c1_25, %c0_26, %c0_27] : memref<3x32x32xbf16, #tpu.memory_space<vmem>>, vector<1x32x32xbf16>
    %37 = vector.shape_cast %36 : vector<1x32x32xbf16> to vector<32x32xbf16>
    %cst_28 = arith.constant dense<0.000000e+00> : vector<1x32xf32>
    %38 = tpu.matmul %17, %37, %cst_28 {dimension_numbers = #tpu.dot_dimension_numbers<[1], [0], [0], [1], [0, 0, 1, 1], [], []>} : vector<1x32xbf16>, vector<32x32xbf16>, vector<1x32xf32> -> vector<1x32xf32>
    %c1_29 = arith.constant 1 : index
    %c0_30 = arith.constant 0 : index
    %c0_31 = arith.constant 0 : index
    %39 = vector.load %arg7[%c1_29, %c0_30, %c0_31] : memref<3x1x32xf32, #tpu.memory_space<vmem>>, vector<1x1x32xf32>
    %40 = vector.shape_cast %39 : vector<1x1x32xf32> to vector<1x32xf32>
    %41 = arith.addf %38, %40 : vector<1x32xf32>
    %c2 = arith.constant 2 : index
    %c0_32 = arith.constant 0 : index
    %c0_33 = arith.constant 0 : index
    %42 = vector.load %arg4[%c2, %c0_32, %c0_33] : memref<3x32x32xbf16, #tpu.memory_space<vmem>>, vector<1x32x32xbf16>
    %43 = vector.shape_cast %42 : vector<1x32x32xbf16> to vector<32x32xbf16>
    %cst_34 = arith.constant dense<0.000000e+00> : vector<1x32xf32>
    %44 = tpu.matmul %15, %43, %cst_34 {dimension_numbers = #tpu.dot_dimension_numbers<[1], [0], [0], [1], [0, 0, 1, 1], [], []>} : vector<1x32xbf16>, vector<32x32xbf16>, vector<1x32xf32> -> vector<1x32xf32>
    %c2_35 = arith.constant 2 : index
    %c0_36 = arith.constant 0 : index
    %c0_37 = arith.constant 0 : index
    %45 = vector.load %arg6[%c2_35, %c0_36, %c0_37] : memref<3x1x32xf32, #tpu.memory_space<vmem>>, vector<1x1x32xf32>
    %46 = vector.shape_cast %45 : vector<1x1x32xf32> to vector<1x32xf32>
    %47 = arith.addf %44, %46 : vector<1x32xf32>
    %c2_38 = arith.constant 2 : index
    %c0_39 = arith.constant 0 : index
    %c0_40 = arith.constant 0 : index
    %48 = vector.load %arg5[%c2_38, %c0_39, %c0_40] : memref<3x32x32xbf16, #tpu.memory_space<vmem>>, vector<1x32x32xbf16>
    %49 = vector.shape_cast %48 : vector<1x32x32xbf16> to vector<32x32xbf16>
    %cst_41 = arith.constant dense<0.000000e+00> : vector<1x32xf32>
    %50 = tpu.matmul %17, %49, %cst_41 {dimension_numbers = #tpu.dot_dimension_numbers<[1], [0], [0], [1], [0, 0, 1, 1], [], []>} : vector<1x32xbf16>, vector<32x32xbf16>, vector<1x32xf32> -> vector<1x32xf32>
    %c2_42 = arith.constant 2 : index
    %c0_43 = arith.constant 0 : index
    %c0_44 = arith.constant 0 : index
    %51 = vector.load %arg7[%c2_42, %c0_43, %c0_44] : memref<3x1x32xf32, #tpu.memory_space<vmem>>, vector<1x1x32xf32>
    %52 = vector.shape_cast %51 : vector<1x1x32xf32> to vector<1x32xf32>
    %53 = arith.addf %50, %52 : vector<1x32xf32>
    %54 = arith.addf %23, %29 : vector<1x32xf32>
    %55 = arith.negf %54 : vector<1x32xf32>
    %56 = math.exp %55 : vector<1x32xf32>
    %cst_45 = arith.constant 1.000000e+00 : f32
    %57 = vector.broadcast %cst_45 : f32 to vector<1x32xf32>
    %58 = arith.addf %57, %56 : vector<1x32xf32>
    %59 = arith.divf %57, %58 : vector<1x32xf32>
    %60 = arith.addf %35, %41 : vector<1x32xf32>
    %61 = arith.negf %60 : vector<1x32xf32>
    %62 = math.exp %61 : vector<1x32xf32>
    %cst_46 = arith.constant 1.000000e+00 : f32
    %63 = vector.broadcast %cst_46 : f32 to vector<1x32xf32>
    %64 = arith.addf %63, %62 : vector<1x32xf32>
    %65 = arith.divf %63, %64 : vector<1x32xf32>
    %66 = arith.mulf %59, %53 : vector<1x32xf32>
    %67 = arith.addf %47, %66 : vector<1x32xf32>
    %68 = math.tanh %67 : vector<1x32xf32>
    %cst_47 = arith.constant 1.000000e+00 : f32
    %69 = vector.broadcast %cst_47 : f32 to vector<1x32xf32>
    %70 = arith.subf %69, %65 : vector<1x32xf32>
    %71 = arith.mulf %70, %68 : vector<1x32xf32>
    %72 = arith.mulf %65, %16 : vector<1x32xf32>
    %73 = arith.addf %71, %72 : vector<1x32xf32>
    %c0_48 = arith.constant 0 : index
    %c0_49 = arith.constant 0 : index
    %74 = vector.load %arg12[%c0_48, %c0_49] : memref<1x32xf32, #tpu.memory_space<vmem>>, vector<1x32xf32>
    tpu.vector_store %arg12[%c0_48, %c0_49], %73 {strides = array<i32>} : memref<1x32xf32, #tpu.memory_space<vmem>>, vector<1x32xf32>,
    %75 = arith.truncf %73 : vector<1x32xf32> to vector<1x32xbf16>
    %c0_50 = arith.constant 0 : index
    %c0_51 = arith.constant 0 : index
    %76 = vector.load %arg8[%c0_50, %c0_51] : memref<32x128xbf16, #tpu.memory_space<vmem>>, vector<32x128xbf16>
    %cst_52 = arith.constant dense<0.000000e+00> : vector<1x128xf32>
    %77 = tpu.matmul %75, %76, %cst_52 {dimension_numbers = #tpu.dot_dimension_numbers<[1], [0], [0], [1], [0, 0, 1, 1], [], []>} : vector<1x32xbf16>, vector<32x128xbf16>, vector<1x128xf32> -> vector<1x128xf32>
    %c0_53 = arith.constant 0 : index
    %c0_54 = arith.constant 0 : index
    %78 = vector.load %arg9[%c0_53, %c0_54] : memref<1x128xf32, #tpu.memory_space<vmem>>, vector<1x128xf32>
    %79 = arith.addf %77, %78 : vector<1x128xf32>
    %cst_55 = arith.constant dense<0xFF800000> : vector<1xf32>
    %80 = vector.multi_reduction <maximumf>, %79, %cst_55 [1] : vector<1x128xf32> to vector<1xf32>
    %81 = vector.shape_cast %80 : vector<1xf32> to vector<1x1xf32>
    %82 = vector.broadcast %81 : vector<1x1xf32> to vector<1x128xf32>
    %83 = arith.subf %79, %82 : vector<1x128xf32>
    %84 = math.exp %83 : vector<1x128xf32>
    %cst_56 = arith.constant dense<0.000000e+00> : vector<1xf32>
    %85 = vector.multi_reduction <add>, %84, %cst_56 [1] : vector<1x128xf32> to vector<1xf32>
    %86 = vector.shape_cast %85 : vector<1xf32> to vector<1x1xf32>
    %87 = math.log %86 : vector<1x1xf32>
    %88 = arith.addf %87, %81 : vector<1x1xf32>
    %89 = vector.broadcast %88 : vector<1x1xf32> to vector<1x128xf32>
    %90 = arith.subf %79, %89 : vector<1x128xf32>
    %91 = vector.shape_cast %90 : vector<1x128xf32> to vector<1x1x128xf32>
    %c0_57 = arith.constant 0 : index
    %c0_58 = arith.constant 0 : index
    %c0_59 = arith.constant 0 : index
    %92 = vector.load %arg10[%c0_57, %c0_58, %c0_59] : memref<1x1x128xf32, #tpu.memory_space<vmem>>, vector<1x1x128xf32>
    tpu.vector_store %arg10[%c0_57, %c0_58, %c0_59], %91 {strides = array<i32>} : memref<1x1x128xf32, #tpu.memory_space<vmem>>, vector<1x1x128xf32>,
    %c7_i32 = arith.constant 7 : i32
    %93 = arith.cmpi eq, %arg0, %c7_i32 : i32
    %94 = arith.extui %93 : i1 to i32
    %c0_i32_60 = arith.constant 0 : i32
    %95 = arith.cmpi ne, %94, %c0_i32_60 : i32
    scf.if %95 {
      %c0_61 = arith.constant 0 : index
      %c0_62 = arith.constant 0 : index
      %96 = vector.load %arg11[%c0_61, %c0_62] : memref<1x32xf32, #tpu.memory_space<vmem>>, vector<1x32xf32>
      tpu.vector_store %arg11[%c0_61, %c0_62], %73 {strides = array<i32>} : memref<1x32xf32, #tpu.memory_space<vmem>>, vector<1x32xf32>,
    } else {
    }
    return
  }
  func.func @transform_0(%arg0: i32, %arg1: memref<8xi32, #tpu.memory_space<smem>>) -> (i32, i32) {
    %c0_i32 = arith.constant 0 : i32
    %c0_i32_0 = arith.constant 0 : i32
    %c0_i32_1 = arith.constant 0 : i32
    return %c0_i32, %c0_i32_0 : i32, i32
  }
  func.func @transform_1(%arg0: i32, %arg1: memref<8xi32, #tpu.memory_space<smem>>) -> (i32, i32) {
    %c0_i32 = arith.constant 0 : i32
    %c0_i32_0 = arith.constant 0 : i32
    %c0_i32_1 = arith.constant 0 : i32
    return %c0_i32, %c0_i32_0 : i32, i32
  }
  func.func @transform_2(%arg0: i32, %arg1: memref<8xi32, #tpu.memory_space<smem>>) -> (i32, i32, i32) {
    %c0_i32 = arith.constant 0 : i32
    %c0_i32_0 = arith.constant 0 : i32
    %c0_i32_1 = arith.constant 0 : i32
    %c0_i32_2 = arith.constant 0 : i32
    return %c0_i32, %c0_i32_0, %c0_i32_1 : i32, i32, i32
  }
  func.func @transform_3(%arg0: i32, %arg1: memref<8xi32, #tpu.memory_space<smem>>) -> (i32, i32, i32) {
    %c0_i32 = arith.constant 0 : i32
    %c0_i32_0 = arith.constant 0 : i32
    %c0_i32_1 = arith.constant 0 : i32
    %c0_i32_2 = arith.constant 0 : i32
    return %c0_i32, %c0_i32_0, %c0_i32_1 : i32, i32, i32
  }
  func.func @transform_4(%arg0: i32, %arg1: memref<8xi32, #tpu.memory_space<smem>>) -> (i32, i32, i32) {
    %c0_i32 = arith.constant 0 : i32
    %c0_i32_0 = arith.constant 0 : i32
    %c0_i32_1 = arith.constant 0 : i32
    %c0_i32_2 = arith.constant 0 : i32
    return %c0_i32, %c0_i32_0, %c0_i32_1 : i32, i32, i32
  }
  func.func @transform_5(%arg0: i32, %arg1: memref<8xi32, #tpu.memory_space<smem>>) -> (i32, i32, i32) {
    %c0_i32 = arith.constant 0 : i32
    %c0_i32_0 = arith.constant 0 : i32
    %c0_i32_1 = arith.constant 0 : i32
    %c0_i32_2 = arith.constant 0 : i32
    return %c0_i32, %c0_i32_0, %c0_i32_1 : i32, i32, i32
  }
  func.func @transform_6(%arg0: i32, %arg1: memref<8xi32, #tpu.memory_space<smem>>) -> (i32, i32) {
    %c0_i32 = arith.constant 0 : i32
    %c0_i32_0 = arith.constant 0 : i32
    %c0_i32_1 = arith.constant 0 : i32
    return %c0_i32, %c0_i32_0 : i32, i32
  }
  func.func @transform_7(%arg0: i32, %arg1: memref<8xi32, #tpu.memory_space<smem>>) -> (i32, i32) {
    %c0_i32 = arith.constant 0 : i32
    %c0_i32_0 = arith.constant 0 : i32
    %c0_i32_1 = arith.constant 0 : i32
    return %c0_i32, %c0_i32_0 : i32, i32
  }
  func.func @transform_8(%arg0: i32, %arg1: memref<8xi32, #tpu.memory_space<smem>>) -> (i32, i32, i32) {
    %c0_i32 = arith.constant 0 : i32
    %c0_i32_0 = arith.constant 0 : i32
    %c0_i32_1 = arith.constant 0 : i32
    return %arg0, %c0_i32, %c0_i32_0 : i32, i32, i32
  }
  func.func @transform_9(%arg0: i32, %arg1: memref<8xi32, #tpu.memory_space<smem>>) -> (i32, i32) {
    %c0_i32 = arith.constant 0 : i32
    %c0_i32_0 = arith.constant 0 : i32
    %c0_i32_1 = arith.constant 0 : i32
    return %c0_i32, %c0_i32_0 : i32, i32
  }
}

</mosaic_0001>

<bundles_post_ra>
// kernel: tpu_custom_call.1
= control target key start
LH: loop header
LB: loop body
LE: loop exit
PB: predicated region body
PF: predicated region fallthrough
CT: control target
= control target key end

     0   :  { %s1184_s16 = smov [#allocation4]   ;;  %s1431_s0 = inlined_call_operand.vmem [shape: s32[8], index: 0, kind: input, shape index: {}]   ;;  %s1432_s1 = inlined_call_operand.vmem [shape: f32[1,32], index: 1, kind: input, shape index: {}]   ;;  %s1433_s2 = inlined_call_operand.vmem [shape: bf16[40,32], index: 2, kind: input, shape index: {}]   ;;  %s1434_s3 = inlined_call_operand.hbm [shape: bf16[3,32,32], index: 3, kind: input, shape index: {}]   ;;  %s1435_s4 = inlined_call_operand.hbm [shape: bf16[3,32,32], index: 4, kind: input, shape index: {}]   ;;  %s1436_s5 = inlined_call_operand.vmem [shape: f32[3,1,32], index: 5, kind: input, shape index: {}]   ;;  %s1437_s6 = inlined_call_operand.vmem [shape: f32[3,1,32], index: 6, kind: input, shape index: {}]   ;;  %s1438_s7 = inlined_call_operand.vmem [shape: bf16[32,128], index: 7, kind: input, shape index: {}]   ;;  %s1439_s8 = inlined_call_operand.vmem [shape: f32[1,128], index: 8, kind: input, shape index: {}]   ;;  %s1440_s9 = inlined_call_operand.hbm [shape: f32[8,1,128], index: 9, kind: output, shape index: {0}]   ;;  %s1441_s10 = inlined_call_operand.hbm [shape: f32[1,32], index: 10, kind: output, shape index: {1}]  }
   0x1   :  { %1442 = sst [smem:[#allocation18_spill]] %s1432_s1  ;;  %s17_s15 = sshll.u32 %s1431_s0, 4  ;;  %s18_s15 = int_to_ptr.vmem [resolvable:$true] %s17_s15 }
   0x2   :  { %1443 = sst [smem:[#allocation19_spill]] %s1433_s2 }
   0x3   :  { %20 = dma.vmem_to_smem %s18_s15, 16, %s1184_s16, [#allocation3] }
   0x4   :  { %1150 = dma.done.wait [#allocation3], 16 }
   0x5   :  { %1151 = vsyncadd [#allocation3], 4294967280 }
   0x6   :  { %23 = sfence }
   0x7   :  { %24 = vsyncpa [#allocation6], 0 }
   0x8   :  { %25 = vsyncpa [#allocation9], 0 }
   0x9   :  { %26 = vsyncpa [#allocation7], 0 }
   0xa   :  { %28 = vsyncpa [#allocation7 + $0x1], 0 }
   0xb   :  { %29 = vsyncpa [#allocation12], 0  ;;  %s1249_s17 = smov 0   ;;  %s1251_s18 = smov 0  }
   0xc   :  { %s1253_s19 = smov 0   ;;  %s1255_s20 = smov 0  }
   0xd LB: > { %s1270_s0 = sadd.s32 4294967295, %s1182_s20   ;;  %s813_s21 = sadd.s32 4294967294, %s1182_s20   ;;  %s1182_s20 = sphi %s1255_s20, %s1452_s20   ;;  %s1178_s19 = sphi %s1253_s19, %s1451_s19   ;;  %s1174_s18 = sphi %s1251_s18, %s1450_s18   ;;  %s1170_s17 = sphi %s1249_s17, %s1449_s17  }
   0xe   : > { %s1274_s22 = sadd.s32 1, %s1182_s20   ;;  %s210_s23 = sadd.s32 1, %s1178_s19 }
   0xf   : > { %s207_s24 = ssub.s32 %s1182_s20, %s1274_s22  ;;  %p220_p0 = scmp.ne.s32.totalorder %s1178_s19, %s1174_s18 }
  0x10   : > { %p208_p1 = scmp.eq.s32.totalorder %s207_s24, 0  ;;  %p221_p2 = scmp.eq.s32.totalorder %s1270_s0, 7 }
  0x11   : > { %p226_p3 = scmp.ne.s32.totalorder %s1174_s18, %s1170_s17  ;;  %p227_p4 = scmp.eq.s32.totalorder %s813_s21, 7 }
  0x12   : > { %s1285_s25 = scalar_select %p208_p1, %s1178_s19, %s210_s23  }
  0x13   : > { %p1289_p5 = por %p221_p2, %p220_p0  ;;  %p1293_p6 = por %p227_p4, %p226_p3 }
  0x14   : > { %p814_p7 = scmp.ge.s32.totalorder %s1182_s20, 1  ;;  %p255_p8 = scmp.lt.s32.totalorder %s1182_s20, 9 }
  0x15   : > { %p815_p9 = scmp.ne.s32.totalorder %s1270_s0, 0  ;;  %p946_p10 = scmp.eq.s32.totalorder %s1270_s0, 0 }
  0x16   : > { %p1301_p11 = pnand %p814_p7, %p255_p8  ;;  %s272_s11 = sshll.u32 %s1434_s3, 4  ;;  %s273_s11 = int_to_ptr.hbm [resolvable:$true] %s272_s11 }
  0x17   : > { %s1185_s12 = smov [#allocation5]   ;;  %s286_s16 = sshll.u32 %s1435_s4, 4  ;;  %s287_s16 = int_to_ptr.hbm [resolvable:$true] %s286_s16 }
  0x18   : > { %p935_p12 = pneg %p1301_p11  ;;  %s274_s13 = sshll.u32 %s1185_s12, 4  ;;  %s275_s13 = int_to_ptr.vmem [resolvable:$true] %s274_s13 }
  0x19   : > { %s1186_s21 = smov 64   ;;  %s1187_s23 = smov 4  }
  0x1a   : > { %p936_p13 = pnand %p946_p10, %p935_p12  ;;  %s1188_s24 = smov [#allocation8]  }
  0x1b   : > { %s288_s29 = sshll.u32 %s1188_s24, 4  ;;  %316 = sbr.rel (%p1301_p11) target bundleno = 786 (0x312), region = 52  ;;  %s289_s29 = int_to_ptr.vmem [resolvable:$true] %s288_s29 }
  0x1c   : > { %938 = dma.hbm_to_vmem [thread:$0]  (!%p936_p13), %s273_s11, 768, %s275_s13, [#allocation6], %s1186_s21, %s1186_s21, %s1187_s23  }
  0x1d   : > { %941 = dma.hbm_to_vmem [thread:$0]  (!%p936_p13), %s287_s16, 768, %s289_s29, [#allocation9], %s1186_s21, %s1186_s21, %s1187_s23  }
  0x20   : > { %1153 = dma.done.wait (%p946_p10), [#allocation6], 768  }
  0x21   : > { %1155 = vsyncadd (%p946_p10), [#allocation6], 4294966528 }
  0x22   : > { %1157 = dma.done.wait (%p946_p10), [#allocation9], 768  }
  0x23   : > { %1159 = vsyncadd (%p946_p10), [#allocation9], 4294966528  ;;  %s348_s30 = sand.u32 1, %s1174_s18   ;;  %356 = sbr.rel (%p815_p9) target bundleno = 44 (0x2c), region = 64 }
  0x24   : > { %s1328_s11 = scalar_lea.vmem [#allocation10], %s348_s30  ;;  %s1447_s1 = sld [smem:[#allocation18_spill]] (!%p815_p9) }
  0x28   : > { %vm358_vm0 = vcmask 253952  }
  0x2a   : > { %v357_v0 = vld [vmem:[%s1447_s1] sm:$0x1] }
  0x2b   : > { %359 = vst.msk [vmem:[#allocation2] sm:$0x1] %vm358_vm0, %v357_v0 }
  0x2c PF: > { %s1448_s2 = sld [smem:[#allocation19_spill]]  ;;  %v361_v2 = vlaneseq  ;;  %v910_v4 = vld [vmem:[#allocation8 + $0x8] sm:$0xff]  ;;  %vm392_vm1 = vcmask 1043456   ;;  %v908_v5 = vld [vmem:[#allocation5 + $0x8] sm:$0xff]  ;;  %v909_v9 = vld [vmem:[#allocation8] sm:$0xff]  ;;  %vm430_vm3 = vcmask 261120  }
  0x2d   : > { %s360_s15 = sld [smem:[#allocation4 + %s1270_s0]]  ;;  %v912_v6 = vld [vmem:[#allocation5 + $0x18] sm:$0xff]  ;;  %473 = vmatpush.bf16.msra.mxu2 %v910_v4  ;;  %440 = vmatpush.bf16.msra.mxu1 %v908_v5  ;;  %v916_v11 = vld [vmem:[#allocation5 + $0x28] sm:$0xff]  ;;  %v1189_v17 = vmov 0.0   ;;  %vm388_vm4 = vcmask 326656   ;;  %v907_v20 = vld [vmem:[#allocation5] sm:$0xff] }
  0x2e   : > { %v362_v8 = vand.u32 127, %v361_v2  ;;  %505 = vmatpush.bf16.msra.mxu3 %v912_v6  ;;  %v911_v21 = vld [vmem:[#allocation5 + $0x10] sm:$0xff]  ;;  %v915_v22 = vld [vmem:[#allocation5 + $0x20] sm:$0xff]  ;;  %v914_v23 = vld [vmem:[#allocation8 + $0x18] sm:$0xff]  ;;  %vm655_vm13 = vcmask 253952   ;;  %vm691_vm14 = vcmask 1040384  }
  0x2f   : > { %v913_v24 = vld [vmem:[#allocation8 + $0x10] sm:$0xff]  ;;  %v918_v25 = vld [vmem:[#allocation8 + $0x28] sm:$0xff]  ;;  %v917_v26 = vld [vmem:[#allocation8 + $0x20] sm:$0xff]  ;;  %p900_p0 = scmp.ne.s32.totalorder %s1270_s0, 7 }
  0x30   : > { %v451_v33 = vld [vmem:[%s1437_s6] sm:$0x1]  ;;  %v920_v43 = vld [vmem:[%s1438_s7 + $0x8] sm:$0xff]  ;;  %v849_v47 = vld [vmem:[%s1436_s5 + $0x1] sm:$0x1] }
  0x31   : > { %474 = vmatpush.bf16.msra.mxu2 %v909_v9  ;;  %441 = vmatpush.bf16.msra.mxu1 %v907_v20  ;;  %v417_v34 = vld [vmem:[%s1436_s5] sm:$0x1]  ;;  %v859_v49 = vld [vmem:[%s1437_s6 + $0x1] sm:$0x1]  ;;  %v869_v9 = vld [vmem:[%s1436_s5 + $0x2] sm:$0x1] }
  0x32   : > { %v372_v1 = vld [vmem:[%s1448_s2 + $0x10] sm:$0xf]  ;;  %v1339_v10 = vld [vmem:[#allocation2] sm:$0x1]  ;;  %v906_v13 = vld [vmem:[%s1448_s2 + $0x8] sm:$0xff]  ;;  %506 = vmatpush.bf16.msra.mxu3 %v911_v21 }
  0x33   : > { %v382_v3 = vunpack.c.l.b16 %v372_v1  ;;  %v363_v14 = vstv %s360_s15  ;;  %v412_v15 = vpack.c.bf16 %v1339_v10, %v1339_v10  ;;  %v905_v16 = vld [vmem:[%s1448_s2] sm:$0xff] }
  0x34   : > { %vm364_vm2 = vcmp.eq.s32.totalorder %v362_v8, %v363_v14  ;;  %v919_v45 = vld [vmem:[%s1438_s7] sm:$0xff] }
  0x35   : > { %v385_v7 = vpack.c.b16 %v382_v3, %v382_v3  ;;  %569 = vmatpush.bf16.msrb.mxu2 %v916_v11  ;;  %v821_v18 = vsel %vm364_vm2, 1.0, %v1189_v17  ;;  %537 = vmatpush.bf16.msrb.mxu1 %v914_v23  ;;  %v879_v1 = vld [vmem:[%s1437_s6 + $0x2] sm:$0x1] }
  0x36   : > { %848 = vmatmul.msk.bf16.vlgmr.msra.gmra.mxu2 %vm430_vm3, %v412_v15  ;;  %v367_v19 = vpack.c.bf16 %v821_v18, %v821_v18  ;;  %601 = vmatpush.bf16.msrb.mxu3 %v918_v25 }
  0x37   : > { %v394_v12 = vsel %vm392_vm1, %v385_v7, 0 }
  0x38   : > { %401 = vmatpush.bf16.msra.mxu0 %v394_v12 }
  0x39   : > { %570 = vmatpush.bf16.msrb.mxu2 %v915_v22  ;;  %538 = vmatpush.bf16.msrb.mxu1 %v913_v24 }
  0x3a   : > { %602 = vmatpush.bf16.msrb.mxu3 %v917_v26 }
  0x3c   : > { %402 = vmatpush.bf16.msra.mxu0 %v906_v13 }
  0x40   : > { %403 = vmatpush.bf16.msra.mxu0 %v905_v16 }
  0x43   : > { %830 = vmatmul.msk.bf16.vlgmr.msra.gmra.mxu0 %vm388_vm4, %v367_v19 }
  0x44   : > { %684 = vmatpush.bf16.msrb.mxu0 %v920_v43 }
  0x48   : > { %685 = vmatpush.bf16.msrb.mxu0 %v919_v45 }
  0xb9   : > { %v476_v27 = vpop.f32.mrf.mxu2 }
  0xba   : > { %v477_v35 = vadd.f32 %v476_v27, %v451_v33 }
  0xc0   : > { %v405_v28 = vpop.f32.mrf.mxu0 }
  0xc1   : > { %v409_v29 = vmax.f32 %v405_v28, 0.0  ;;  %v478_v31 = vpop.f32.mrf.mxu2 }
  0xc3   : > { %v410_v30 = vpack.c.bf16 %v409_v29, %v409_v29 }
  0xc5   : > { %839 = vmatmul.msk.bf16.vlgmr.msra.gmra.mxu1 %vm430_vm3, %v410_v30  ;;  %858 = vmatmul.msk.bf16.vlgmr.msra.gmra.mxu3 %vm430_vm3, %v410_v30 }
  0xc6   : > { %878 = vmatmul.msk.bf16.vlgmr.msrb.gmra.mxu2 %vm430_vm3, %v410_v30  ;;  %v662_v30 = vld [vmem:[%s1439_s8] sm:$0x1] }
  0xc8   : > { %v407_v32 = vpop.f32.mrf.mxu0 }
  0xd5   : > { %868 = vmatmul.msk.bf16.vlgmr.msrb.gmra.mxu1 %vm430_vm3, %v412_v15  ;;  %888 = vmatmul.msk.bf16.vlgmr.msrb.gmra.mxu3 %vm430_vm3, %v412_v15 }
 0x142   : > { %v443_v36 = vpop.f32.mrf.mxu1 }
 0x143   : > { %v444_v37 = vadd.f32 %v443_v36, %v417_v34 }
 0x145   : > { %v608_v38 = vadd.f32 %v477_v35, %v444_v37 }
 0x147   : > { %v889_v39 = vmul.f32 -1.442695, %v608_v38 }
 0x148   : > { %v508_v40 = vpop.f32.mrf.mxu3 }
 0x149   : > { %992 = vpow2.f32 %v889_v39  ;;  %v572_v41 = vpop.f32.mrf.mxu2  ;;  %v509_v52 = vadd.f32 %v849_v47, %v508_v40 }
 0x14a   : > { %v445_v42 = vpop.f32.mrf.mxu1  ;;  %v573_v13 = vadd.f32 %v869_v9, %v572_v41 }
 0x14f   : > { %v993_v44 = vpop.eup %992 }
 0x150   : > { %v612_v46 = vadd.f32 1.0, %v993_v44  ;;  %v510_v48 = vpop.f32.mrf.mxu3 }
 0x151   : > { %v574_v50 = vpop.f32.mrf.mxu2 }
 0x152   : > { %994 = vrcp.f32 %v612_v46  ;;  %v540_v51 = vpop.f32.mrf.mxu1  ;;  %v624_v62 = vand.u32 2147483648, %v612_v46  ;;  %v622_v63 = vand.u32 2147483647, %v612_v46  ;;  %vm618_vm6 = vweird.f32 %v612_v46 }
 0x153   : > { %v541_v53 = vadd.f32 %v859_v49, %v540_v51 }
 0x154   : > { %v625_v6 = vor.u32 1.1754944e-38, %v624_v62  ;;  %vm623_vm8 = vcmp.eq.f32.partialorder %v622_v63, 8.507059e+37 }
 0x155   : > { %v628_v54 = vadd.f32 %v541_v53, %v509_v52 }
 0x157   : > { %v890_v55 = vmul.f32 -1.442695, %v628_v54 }
 0x158   : > { %v995_v56 = vpop.eup %994  ;;  %v604_v57 = vpop.f32.mrf.mxu3 }
 0x159   : > { %996 = vpow2.f32 %v890_v55  ;;  %v614_v58 = vmul.f32 %v995_v56, %v612_v46  ;;  %vm619_vm5 = vweird.f32 %v995_v56  ;;  %v605_v7 = vadd.f32 %v879_v1, %v604_v57 }
 0x15a   : > { %v542_v59 = vpop.f32.mrf.mxu1  ;;  %vm620_vm7 = vmor %vm618_vm6, %vm619_vm5 }
 0x15b   : > { %v615_v60 = vsub.f32 1.0, %v614_v58 }
 0x15d   : > { %v616_v61 = vmul.f32 %v995_v56, %v615_v60 }
 0x15f   : > { %v997_v0 = vpop.eup %996  ;;  %v617_v2 = vadd.f32 %v995_v56, %v616_v61 }
 0x160   : > { %v632_v3 = vadd.f32 1.0, %v997_v0  ;;  %v606_v4 = vpop.f32.mrf.mxu3 }
 0x161   : > { %v621_v5 = vsel %vm620_vm7, %v995_v56, %v617_v2 }
 0x162   : > { %998 = vrcp.f32 %v632_v3  ;;  %v626_v8 = vsel %vm623_vm8, %v625_v6, %v621_v5  ;;  %v644_v17 = vand.u32 2147483648, %v632_v3  ;;  %v642_v19 = vand.u32 2147483647, %v632_v3 }
 0x163   : > { %v648_v11 = vmul.f32 %v626_v8, %v605_v7  ;;  %vm638_vm10 = vweird.f32 %v632_v3 }
 0x164   : > { %v645_v21 = vor.u32 1.1754944e-38, %v644_v17  ;;  %vm643_vm12 = vcmp.eq.f32.partialorder %v642_v19, 8.507059e+37 }
 0x165   : > { %v649_v15 = vadd.f32 %v648_v11, %v573_v13 }
 0x167   : > { %1000 = vtanh.f32 %v649_v15 }
 0x168   : > { %v999_v12 = vpop.eup %998 }
 0x169   : > { %v634_v14 = vmul.f32 %v999_v12, %v632_v3  ;;  %vm639_vm9 = vweird.f32 %v999_v12 }
 0x16a   : > { %vm640_vm11 = vmor %vm638_vm10, %vm639_vm9 }
 0x16b   : > { %v635_v16 = vsub.f32 1.0, %v634_v14 }
 0x16d   : > { %v636_v18 = vmul.f32 %v999_v12, %v635_v16  ;;  %v1001_v25 = vpop.eup %1000 }
 0x16f   : > { %v637_v20 = vadd.f32 %v999_v12, %v636_v18 }
 0x171   : > { %v641_v22 = vsel %vm640_vm11, %v999_v12, %v637_v20 }
 0x172   : > { %v646_v23 = vsel %vm643_vm12, %v645_v21, %v641_v22 }
 0x173   : > { %v651_v24 = vsub.f32 1.0, %v646_v23  ;;  %v653_v27 = vmul.f32 %v646_v23, %v1339_v10 }
 0x175   : > { %v652_v26 = vmul.f32 %v1001_v25, %v651_v24 }
 0x177   : > { %v654_v28 = vadd.f32 %v653_v27, %v652_v26 }
 0x179   : > { %656 = vst.msk [vmem:[#allocation2] sm:$0x1] %vm655_vm13, %v654_v28  ;;  %v657_v29 = vpack.c.bf16 %v654_v28, %v654_v28 }
 0x17b   : > { %899 = vmatmul.msk.bf16.vlgmr.msrb.gmra.mxu0 %vm430_vm3, %v657_v29 }
 0x1f8   : > { %v687_v31 = vpop.f32.mrf.mxu0 }
 0x1f9   : > { %v688_v32 = vadd.f32 %v687_v31, %v662_v30 }
 0x1fb   : > { %v692_v33 = vsel %vm691_vm14, %v688_v32, -inf }
 0x1fc   : > { %693 = vmax.xlane.f32.xlu0 %v692_v33 }
 0x200   : > { %v689_v34 = vpop.f32.mrf.mxu0 }
 0x26f   : > { %v694_v35 = vpop.xlane.xlu0 %693 }
 0x270   : > { %v695_v10 = vsub.f32 %v688_v32, %v694_v35 }
 0x272   : > { %v696_v36 = vmul.f32 1.442695, %v695_v10 }
 0x274   : > { %1002 = vpow2.f32 %v696_v36 }
 0x27a   : > { %v1003_v37 = vpop.eup %1002 }
 0x27b   : > { %v698_v38 = vsel %vm691_vm14, %v1003_v37, 0.0 }
 0x27c   : > { %699 = vadd.xlane.f32.xlu0 %v698_v38 }
 0x2ef   : > { %v700_v39 = vpop.xlane.xlu0 %699 }
 0x2f0   : > { %1004 = vlog2.f32 %v700_v39 }
 0x2f6   : > { %v1005_v40 = vpop.eup %1004 }
 0x2f7   : > { %v702_v41 = vmul.f32 0.6931472, %v1005_v40 }
 0x2f9   : > { %v703_v42 = vadd.f32 %v702_v41, %v694_v35  ;;  %709 = sbr.rel (%p900_p0) target bundleno = 767 (0x2ff), region = 68 }
 0x2fb   : > { %v704_v43 = vsub.f32 %v688_v32, %v703_v42 }
 0x2fd   : > { %705 = vst [vmem:[%s1328_s11] sm:$0x1] %v704_v43 }
 0x2fe   : > { %710 = vst.msk [vmem:[#allocation11] sm:$0x1] %vm655_vm13, %v654_v28 }
 0x2ff PF: > { %s720_s29 = scalar_lea.hbm %s1440_s9, %s1270_s0  ;;  %s722_s28 = sshll.u32 %s1328_s11, 4  ;;  %s723_s28 = int_to_ptr.vmem [resolvable:$true] %s722_s28 }
 0x300   : > { %s724_s12 = sshll.u32 %s720_s29, 4  ;;  %s712_s13 = scalar_lea.sflag [#allocation7], %s348_s30  ;;  %s725_s12 = int_to_ptr.hbm [resolvable:$true] %s724_s12 }
 0x301   : > { %s1092_s14 = sshra.s32 %s725_s12, 4  ;;  %s1098_s23 = scalar_lea.hbm %s1440_s9, 8  ;;  %s1093_s14 = int_to_ptr.hbm [resolvable:$true] %s1092_s14 }
 0x302   : > { %s1094_s15 = scalar_lea.hbm %s1093_s14, 1  ;;  %p1099_p7 = scmp.lt.s32.totalorder %s1093_s14, %s1440_s9 }
 0x303   : > { %p1095_p1 = scmp.ne.s32.totalorder %s1093_s14, %s1094_s15  ;;  %p1100_p8 = scmp.lt.s32.totalorder %s1098_s23, %s1094_s15 }
 0x305   : > { %p1096_p3 = pnand %p1095_p1, %p1289_p5  ;;  %p1101_p9 = por %p1100_p8, %p1099_p7 }
 0x307   : > { %p1097_p4 = pneg %p1096_p3 }
 0x309   : > { %p1102_p10 = pnand %p1101_p9, %p1097_p4 }
 0x30b   : > { %1105 = shalt.err (!%p1102_p10)
}
 0x30c   : > { %929 = dma.vmem_to_hbm [thread:$0]  (%p1289_p5), %s723_s28, 16, %s725_s12, %s712_s13  }
 0x30d   : > { %s736_s29 = sshll.u32 %s1441_s10, 4  ;;  %s1190_s2 = smov [#allocation11]   ;;  %s737_s29 = int_to_ptr.hbm [resolvable:$true] %s736_s29 }
 0x30e   : > { %s734_s16 = sshll.u32 %s1190_s2, 4  ;;  %s735_s16 = int_to_ptr.vmem [resolvable:$true] %s734_s16 }
 0x30f   : > { %931 = dma.vmem_to_hbm [thread:$0]  (%p221_p2), %s735_s16, 16, %s737_s29, [#allocation12]  }
 0x310   : > { %1161 = dma.done.wait (%p221_p2), [#allocation12], 16  }
 0x311   : > { %1163 = vsyncadd (%p221_p2), [#allocation12], 4294967280 }
 0x312 PF: > { %p952_p5 = scmp.ge.s32.totalorder %s1182_s20, 2  ;;  %s753_s1 = sand.u32 1, %s1170_s17  }
 0x313   : > { %s754_s26 = scalar_lea.sflag [#allocation7], %s753_s1 }
 0x314   : > { %p943_p11 = pnand %p952_p5, %p1293_p6 }
 0x316   : > { %p944_p12 = pneg %p943_p11 }
 0x318   : > { %1165 = dma.done.wait (%p944_p12), %s754_s26, 16  }
 0x319   : > { %1167 = vsyncadd (%p944_p12), %s754_s26, 4294967280  ;;  %p32_p13 = scmp.ge.s32.totalorder %s1274_s22, 10   ;;  %s1449_s17 = smov %s1174_s18 }
 0x31a   : > { %s1450_s18 = smov %s1178_s19  ;;  %s1451_s19 = smov %s1285_s25 }
 0x31b   : > { %s1452_s20 = smov %s1274_s22  ;;  %34 = sbr.rel (!%p32_p13) target bundleno = 13 (0xd), region = 117 }
 0x320   :  { %759 = vsyncpa [#allocation6], 1 }
 0x321   :  { %761 = vsyncpa [#allocation6 + $0x1], 1 }
 0x322   :  { %762 = vsyncpa [#allocation9], 1 }
 0x323   :  { %763 = vsyncpa [#allocation7], 1 }
 0x324   :  { %765 = vsyncpa [#allocation7 + $0x1], 1 }
 0x325   :  { %766 = vsyncpa [#allocation12], 1 }

</bundles_post_ra>
